<compile_context>
chip_gen: v7x
topology: tpu7x:2x2x1
jax: 0.10.0
libtpu: 0.0.40
codegen_flags: <defaults>
</compile_context>

<pallas_src>
import functools
import math

import jax
import jax.numpy as jnp
from jax import lax
from jax.experimental import pallas as pl
from jax.experimental.pallas import tpu as pltpu

_BN_EPS = 1e-5
_INV_SQRT2 = 1.0 / math.sqrt(2.0)
_C1 = 3
_C2 = 5
_COUT = _C1 + _C2


def _output_kernel(x_ref, scale_ref, shift_ref, wt_ref, b_ref, y_ref, acc_ref,
                   *, seq_len, l_tile, needs_mask):
    l = pl.program_id(1)

    @pl.when(l == 0)
    def _():
        acc_ref[...] = jnp.zeros_like(acc_ref)

    # x block: (TN, C, TL) -- L on lanes, C on sublanes.
    x = x_ref[...].astype(jnp.float32)
    # Folded BatchNorm (eval): per-channel scale/shift, broadcast along lanes.
    xn = x * scale_ref[...][None, :, :] + shift_ref[...][None, :, :]
    # Exact GELU (PyTorch nn.GELU default, erf formulation).
    g = 0.5 * xn * (1.0 + lax.erf(xn * _INV_SQRT2))

    if needs_mask:
        # Remainder L tile: zero out out-of-range lanes so sum/L stays exact.
        lane = l * l_tile + lax.broadcasted_iota(jnp.int32, (1, 1, l_tile), 2)
        g = jnp.where(lane < seq_len, g, 0.0)

    # Partial sum over the L lanes of this tile.
    acc_ref[...] += jnp.sum(g, axis=2)                       # (TN, C)

    @pl.when(l == pl.num_programs(1) - 1)
    def _():
        # mean over L commutes with the 1x1 conv (pointwise linear); dropout is
        # identity at inference.  Both branches fused into one (C, 8) matmul.
        m = acc_ref[...] * (1.0 / seq_len)                   # (TN, C)
        y_ref[...] = (jnp.dot(m, wt_ref[...],
                              preferred_element_type=jnp.float32)
                      + b_ref[...]).astype(y_ref.dtype)      # (TN, 8)


def output_forward(x_ncl, params, *, l_tile=None, n_tile=None):
    """x_ncl: (N, C, L), same layout as the PyTorch module input."""
    N, C, L = x_ncl.shape
    itemsize = jnp.dtype(x_ncl.dtype).itemsize

    # --- fold BatchNorm1d (running stats) into per-channel scale/shift -------
    gamma = params["gamma"].astype(jnp.float32)
    beta = params["beta"].astype(jnp.float32)
    rmean = params["rmean"].astype(jnp.float32)
    rvar = params["rvar"].astype(jnp.float32)
    scale_v = gamma * lax.rsqrt(rvar + _BN_EPS)              # (C,)
    shift_v = beta - rmean * scale_v                         # (C,)
    scale = scale_v.reshape(C, 1)
    shift = shift_v.reshape(C, 1)

    # --- fuse the two 1x1-conv branches into one (C, 8) projection -----------
    w_comb = jnp.concatenate([params["w1"], params["w2"]],
                             axis=0).astype(jnp.float32).T   # (C, 8)
    b_comb = jnp.concatenate([params["b1"], params["b2"]]
                             ).astype(jnp.float32).reshape(1, _COUT)

    # --- tile sizing (conservative: fits default scoped VMEM on v5e/v6e/v7x) -
    tn = n_tile if n_tile is not None else (N if N <= 8 else 8)
    if l_tile is None:
        budget = 4 * 1024 * 1024                 # ~4 MiB per x block (2x buffered)
        if tn * C * L * itemsize <= budget:
            tl = L                               # full L: no (8,128) constraint
        else:
            tl = max(128, (budget // (tn * C * itemsize)) // 128 * 128)
    else:
        tl = l_tile
    num_n = pl.cdiv(N, tn)
    num_l = pl.cdiv(L, tl)
    needs_mask = (num_l * tl != L)

    kernel = functools.partial(_output_kernel, seq_len=L, l_tile=tl,
                               needs_mask=needs_mask)

    y = pl.pallas_call(
        kernel,
        out_shape=jax.ShapeDtypeStruct((N, _COUT), jnp.float32),
        grid=(num_n, num_l),
        in_specs=[
            pl.BlockSpec((tn, C, tl), lambda n, l: (n, 0, l)),   # x tiles
            pl.BlockSpec((C, 1), lambda n, l: (0, 0)),           # BN scale
            pl.BlockSpec((C, 1), lambda n, l: (0, 0)),           # BN shift
            pl.BlockSpec((C, _COUT), lambda n, l: (0, 0)),       # fused weight
            pl.BlockSpec((1, _COUT), lambda n, l: (0, 0)),       # fused bias
        ],
        out_specs=pl.BlockSpec((tn, _COUT), lambda n, l: (n, 0)),
        scratch_shapes=[pltpu.VMEM((tn, C), jnp.float32)],
        compiler_params=pltpu.CompilerParams(
            dimension_semantics=("parallel", "arbitrary")),
    )(x_ncl, scale, shift, w_comb, b_comb)

    return y[:, :_C1], y[:, _C1:]


def _reference(x_ncl, params):
    """Pure-JAX reference mirroring the PyTorch forward (eval mode)."""
    scale = params["gamma"] / jnp.sqrt(params["rvar"] + _BN_EPS)
    shift = params["beta"] - params["rmean"] * scale
    xn = x_ncl * scale[None, :, None] + shift[None, :, None]
    g = 0.5 * xn * (1.0 + lax.erf(xn * _INV_SQRT2))
    c1 = jnp.einsum("oc,ncl->nol", params["w1"], g) + params["b1"][None, :, None]
    c2 = jnp.einsum("oc,ncl->nol", params["w2"], g) + params["b2"][None, :, None]
    return jnp.mean(c1, axis=2), jnp.mean(c2, axis=2)


def _make_params(key, C):
    kg, kb, km, kv, kw1, kb1, kw2, kb2 = jax.random.split(key, 8)
    return {
        "gamma": 1.0 + 0.1 * jax.random.normal(kg, (C,), dtype=jnp.float32),
        "beta": 0.1 * jax.random.normal(kb, (C,), dtype=jnp.float32),
        "rmean": 0.1 * jax.random.normal(km, (C,), dtype=jnp.float32),
        "rvar": 1.0 + 0.1 * jax.random.uniform(kv, (C,), dtype=jnp.float32),
        "w1": jax.random.normal(kw1, (_C1, C), dtype=jnp.float32) / math.sqrt(C),
        "b1": 0.1 * jax.random.normal(kb1, (_C1,), dtype=jnp.float32),
        "w2": jax.random.normal(kw2, (_C2, C), dtype=jnp.float32) / math.sqrt(C),
        "b2": 0.1 * jax.random.normal(kb2, (_C2,), dtype=jnp.float32),
    }


if __name__ == "__main__":
    key = jax.random.PRNGKey(0)
    kp, kx1, kx2 = jax.random.split(key, 3)

    # --- small demo shape (single L tile) ------------------------------------
    N, C, L = 2, 8, 16
    params = _make_params(kp, C)
    x = jax.random.normal(kx1, (N, C, L), dtype=jnp.float32)

    y1, y2 = output_forward(x, params)
    jax.block_until_ready((y1, y2))
    r1, r2 = _reference(x, params)
    assert y1.shape == (N, _C1) and y2.shape == (N, _C2)
    assert jnp.allclose(y1, r1, atol=1e-4, rtol=1e-4)
    assert jnp.allclose(y2, r2, atol=1e-4, rtol=1e-4)

    # --- exercise the L-tiled / masked-remainder path ------------------------
    N2, L2 = 4, 200
    x2 = jax.random.normal(kx2, (N2, C, L2), dtype=jnp.float32)
    z1, z2 = output_forward(x2, params, l_tile=128)   # 2 L-tiles, remainder masked
    jax.block_until_ready((z1, z2))
    s1, s2 = _reference(x2, params)
    assert jnp.allclose(z1, s1, atol=1e-4, rtol=1e-4)
    assert jnp.allclose(z2, s2, atol=1e-4, rtol=1e-4)

    print("KERNEL_OK")
</pallas_src>

<mosaic_0001>
module attributes {stable_mosaic.version = 11 : i64} {
  func.func @_output_kernel(%arg0: i32, %arg1: i32, %arg2: memref<2x8x16xf32, #tpu.memory_space<vmem>>, %arg3: memref<8x1xf32, #tpu.memory_space<vmem>>, %arg4: memref<8x1xf32, #tpu.memory_space<vmem>>, %arg5: memref<8x8xf32, #tpu.memory_space<vmem>>, %arg6: memref<1x8xf32, #tpu.memory_space<vmem>>, %arg7: memref<2x8xf32, #tpu.memory_space<vmem>>, %arg8: memref<2x8xf32, #tpu.memory_space<vmem>>) attributes {dimension_semantics = [#tpu.dimension_semantics<parallel>, #tpu.dimension_semantics<arbitrary>], iteration_bounds = array<i64: 1, 1>, scalar_prefetch = 0 : i64, scratch_operands = 1 : i64, tpu.core_type = #tpu.core_type<tc>, window_params = [{transform_indices = @transform_0, window_bounds = array<i64: 2, 8, 16>}, {pipeline_mode = #tpu.pipeline_mode<synchronous>, transform_indices = @transform_1, window_bounds = array<i64: 8, 1>}, {pipeline_mode = #tpu.pipeline_mode<synchronous>, transform_indices = @transform_2, window_bounds = array<i64: 8, 1>}, {pipeline_mode = #tpu.pipeline_mode<synchronous>, transform_indices = @transform_3, window_bounds = array<i64: 8, 8>}, {pipeline_mode = #tpu.pipeline_mode<synchronous>, transform_indices = @transform_4, window_bounds = array<i64: 1, 8>}, {transform_indices = @transform_5, window_bounds = array<i64: 2, 8>}]} {
    %c0_i32 = arith.constant 0 : i32
    %0 = arith.cmpi eq, %arg1, %c0_i32 : i32
    %1 = arith.extui %0 : i1 to i32
    %c0_i32_0 = arith.constant 0 : i32
    %2 = arith.cmpi ne, %1, %c0_i32_0 : i32
    scf.if %2 {
      %cst_16 = arith.constant 0.000000e+00 : f32
      %27 = vector.broadcast %cst_16 : f32 to vector<2x8xf32>
      %c0_17 = arith.constant 0 : index
      %c0_18 = arith.constant 0 : index
      %28 = vector.load %arg8[%c0_17, %c0_18] : memref<2x8xf32, #tpu.memory_space<vmem>>, vector<2x8xf32>
      tpu.vector_store %arg8[%c0_17, %c0_18], %27 {strides = array<i32>} : memref<2x8xf32, #tpu.memory_space<vmem>>, vector<2x8xf32>,
    } else {
    }
    %c0 = arith.constant 0 : index
    %c0_1 = arith.constant 0 : index
    %c0_2 = arith.constant 0 : index
    %3 = vector.load %arg2[%c0, %c0_1, %c0_2] : memref<2x8x16xf32, #tpu.memory_space<vmem>>, vector<2x8x16xf32>
    %c0_3 = arith.constant 0 : index
    %c0_4 = arith.constant 0 : index
    %4 = vector.load %arg3[%c0_3, %c0_4] : memref<8x1xf32, #tpu.memory_space<vmem>>, vector<8x1xf32>
    %5 = vector.shape_cast %4 : vector<8x1xf32> to vector<1x8x1xf32>
    %6 = vector.broadcast %5 : vector<1x8x1xf32> to vector<2x8x16xf32>
    %7 = arith.mulf %3, %6 : vector<2x8x16xf32>
    %c0_5 = arith.constant 0 : index
    %c0_6 = arith.constant 0 : index
    %8 = vector.load %arg4[%c0_5, %c0_6] : memref<8x1xf32, #tpu.memory_space<vmem>>, vector<8x1xf32>
    %9 = vector.shape_cast %8 : vector<8x1xf32> to vector<1x8x1xf32>
    %10 = vector.broadcast %9 : vector<1x8x1xf32> to vector<2x8x16xf32>
    %11 = arith.addf %7, %10 : vector<2x8x16xf32>
    %cst = arith.constant 5.000000e-01 : f32
    %12 = vector.broadcast %cst : f32 to vector<2x8x16xf32>
    %13 = arith.mulf %12, %11 : vector<2x8x16xf32>
    %cst_7 = arith.constant 0.707106769 : f32
    %14 = vector.broadcast %cst_7 : f32 to vector<2x8x16xf32>
    %15 = arith.mulf %11, %14 : vector<2x8x16xf32>
    %16 = math.erf %15 : vector<2x8x16xf32>
    %cst_8 = arith.constant 1.000000e+00 : f32
    %17 = vector.broadcast %cst_8 : f32 to vector<2x8x16xf32>
    %18 = arith.addf %17, %16 : vector<2x8x16xf32>
    %19 = arith.mulf %13, %18 : vector<2x8x16xf32>
    %c0_9 = arith.constant 0 : index
    %c0_10 = arith.constant 0 : index
    %20 = vector.load %arg8[%c0_9, %c0_10] : memref<2x8xf32, #tpu.memory_space<vmem>>, vector<2x8xf32>
    %cst_11 = arith.constant dense<0.000000e+00> : vector<2x8xf32>
    %21 = vector.multi_reduction <add>, %19, %cst_11 [2] : vector<2x8x16xf32> to vector<2x8xf32>
    %22 = arith.addf %20, %21 : vector<2x8xf32>
    %c0_12 = arith.constant 0 : index
    %c0_13 = arith.constant 0 : index
    %23 = vector.load %arg8[%c0_12, %c0_13] : memref<2x8xf32, #tpu.memory_space<vmem>>, vector<2x8xf32>
    tpu.vector_store %arg8[%c0_12, %c0_13], %22 {strides = array<i32>} : memref<2x8xf32, #tpu.memory_space<vmem>>, vector<2x8xf32>,
    %c0_i32_14 = arith.constant 0 : i32
    %24 = arith.cmpi eq, %arg1, %c0_i32_14 : i32
    %25 = arith.extui %24 : i1 to i32
    %c0_i32_15 = arith.constant 0 : i32
    %26 = arith.cmpi ne, %25, %c0_i32_15 : i32
    scf.if %26 {
      %c0_16 = arith.constant 0 : index
      %c0_17 = arith.constant 0 : index
      %27 = vector.load %arg8[%c0_16, %c0_17] : memref<2x8xf32, #tpu.memory_space<vmem>>, vector<2x8xf32>
      %cst_18 = arith.constant 6.250000e-02 : f32
      %28 = vector.broadcast %cst_18 : f32 to vector<2x8xf32>
      %29 = arith.mulf %27, %28 : vector<2x8xf32>
      %c0_19 = arith.constant 0 : index
      %c0_20 = arith.constant 0 : index
      %30 = vector.load %arg5[%c0_19, %c0_20] : memref<8x8xf32, #tpu.memory_space<vmem>>, vector<8x8xf32>
      %cst_21 = arith.constant dense<0.000000e+00> : vector<2x8xf32>
      %31 = tpu.matmul %29, %30, %cst_21 {dimension_numbers = #tpu.dot_dimension_numbers<[1], [0], [0], [1], [0, 0, 1, 1], [], []>} : vector<2x8xf32>, vector<8x8xf32>, vector<2x8xf32> -> vector<2x8xf32>
      %c0_22 = arith.constant 0 : index
      %c0_23 = arith.constant 0 : index
      %32 = vector.load %arg6[%c0_22, %c0_23] : memref<1x8xf32, #tpu.memory_space<vmem>>, vector<1x8xf32>
      %33 = vector.broadcast %32 : vector<1x8xf32> to vector<2x8xf32>
      %34 = arith.addf %31, %33 : vector<2x8xf32>
      %c0_24 = arith.constant 0 : index
      %c0_25 = arith.constant 0 : index
      %35 = vector.load %arg7[%c0_24, %c0_25] : memref<2x8xf32, #tpu.memory_space<vmem>>, vector<2x8xf32>
      tpu.vector_store %arg7[%c0_24, %c0_25], %34 {strides = array<i32>} : memref<2x8xf32, #tpu.memory_space<vmem>>, vector<2x8xf32>,
    } else {
    }
    return
  }
  func.func @transform_0(%arg0: i32, %arg1: i32) -> (i32, i32, i32) {
    %c0_i32 = arith.constant 0 : i32
    %c0_i32_0 = arith.constant 0 : i32
    return %arg0, %c0_i32, %arg1 : i32, i32, i32
  }
  func.func @transform_1(%arg0: i32, %arg1: i32) -> (i32, i32) {
    %c0_i32 = arith.constant 0 : i32
    %c0_i32_0 = arith.constant 0 : i32
    %c0_i32_1 = arith.constant 0 : i32
    return %c0_i32, %c0_i32_0 : i32, i32
  }
  func.func @transform_2(%arg0: i32, %arg1: i32) -> (i32, i32) {
    %c0_i32 = arith.constant 0 : i32
    %c0_i32_0 = arith.constant 0 : i32
    %c0_i32_1 = arith.constant 0 : i32
    return %c0_i32, %c0_i32_0 : i32, i32
  }
  func.func @transform_3(%arg0: i32, %arg1: i32) -> (i32, i32) {
    %c0_i32 = arith.constant 0 : i32
    %c0_i32_0 = arith.constant 0 : i32
    %c0_i32_1 = arith.constant 0 : i32
    return %c0_i32, %c0_i32_0 : i32, i32
  }
  func.func @transform_4(%arg0: i32, %arg1: i32) -> (i32, i32) {
    %c0_i32 = arith.constant 0 : i32
    %c0_i32_0 = arith.constant 0 : i32
    %c0_i32_1 = arith.constant 0 : i32
    return %c0_i32, %c0_i32_0 : i32, i32
  }
  func.func @transform_5(%arg0: i32, %arg1: i32) -> (i32, i32) {
    %c0_i32 = arith.constant 0 : i32
    %c0_i32_0 = arith.constant 0 : i32
    return %arg0, %c0_i32 : i32, i32
  }
}

</mosaic_0001>

<bundles_post_ra>
// kernel: tpu_custom_call.1
= control target key start
LH: loop header
LB: loop body
LE: loop exit
PB: predicated region body
PF: predicated region fallthrough
CT: control target
= control target key end

     0   :  { %s292_s0 = inlined_call_operand.vmem [shape: f32[2,8,16], index: 0, kind: input, shape index: {}]   ;;  %s293_s1 = inlined_call_operand.vmem [shape: f32[8,1], index: 1, kind: input, shape index: {}]   ;;  %s294_s2 = inlined_call_operand.vmem [shape: f32[8,1], index: 2, kind: input, shape index: {}]   ;;  %s295_s3 = inlined_call_operand.vmem [shape: f32[8,8], index: 3, kind: input, shape index: {}]   ;;  %s296_s4 = inlined_call_operand.vmem [shape: f32[1,8], index: 4, kind: input, shape index: {}]   ;;  %s297_s5 = inlined_call_operand.hbm [shape: f32[2,8], index: 5, kind: output, shape index: {}]  }
   0x1   :  { %v29_v0 = vld [vmem:[%s293_s1] sm:$0xff] }
   0x2   :  { %10 = vsyncpa [#allocation4], 0  ;;  %v225_v1 = vmov 0   ;;  %v37_v2 = vld [vmem:[%s294_s2] sm:$0xff]  ;;  %v28_v5 = vld [vmem:[%s292_s0 + $0x8] sm:$0xff]  ;;  %vm56_vm0 = vcmask 130048   ;;  %v65_v25 = vlaneseq }
   0x3   :  { %196 = vset.pattern.permute.xlu0 %v225_v1  ;;  %v27_v4 = vld [vmem:[%s292_s0] sm:$0xff]  ;;  %vm25_vm1 = vcmask 58368   ;;  %v226_v23 = vmov 0.0   ;;  %vm227_vm2 = vmmov 0   ;;  %vm75_vm3 = vcmask 1041409   ;;  %s228_s26 = smov [#allocation3]  }
   0x4   :  { %32 = vperm.xlu0 %196, %v29_v0   ;;  %26 = vst.msk [vmem:[#allocation2] sm:$0x3] %vm25_vm1, %v226_v23  ;;  %187 = vmatprep.subr.mxu0 %v226_v23  ;;  %v86_v24 = vld [vmem:[%s295_s3] sm:$0xff]  ;;  %v66_v26 = vand.u32 127, %v65_v25  ;;  %v68_v27 = vshrl.u32 %v65_v25, 7  ;;  %vm94_vm4 = vcmask 64512  }
   0x5   :  { %188 = vmatpush3.msra.mxu0 %v86_v24  ;;  %189 = vmatprep.mubr.msk.f32.mxu0 %vm227_vm2, %v226_v23  ;;  %v183_v38 = vld [vmem:[%s296_s4] ss:$0 sm:$0xff]  ;;  %s175_s27 = sshll.u32 %s228_s26, 4  ;;  %s176_s27 = int_to_ptr.vmem [resolvable:$true] %s175_s27 }
   0x6   :  { %v69_v29 = vsub.s32 %v66_v26, %v68_v27  ;;  %s201_s28 = scalar_lea.vmem %s176_s27, 32  ;;  %p206_p1 = scmp.lt.s32.totalorder %s176_s27, %s176_s27 }
   0x7   :  { %p202_p0 = scmp.ne.s32.totalorder %s176_s27, %s201_s28  ;;  %p207_p2 = scmp.lt.s32.totalorder %s201_s28, %s201_s28 }
   0x8   :  { %40 = vperm.xlu0 %196, %v37_v2  }
   0x9   :  { %p208_p3 = por %p207_p2, %p206_p1 }
   0xb   :  { %v55_v33 = vld [vmem:[#allocation2] sm:$0x3]  ;;  %p209_p4 = pnand %p208_p3, %p202_p0 }
  0x83   :  { %v33_v3 = vpop.permute.xlu0 %32 }
  0x84   :  { %v35_v6 = vmul.f32 %v33_v3, %v27_v4  ;;  %v36_v7 = vmul.f32 %v33_v3, %v28_v5 }
  0x87   :  { %v41_v8 = vpop.permute.xlu0 %40 }
  0x88   :  { %v43_v9 = vadd.f32 %v41_v8, %v35_v6  ;;  %v44_v10 = vadd.f32 %v41_v8, %v36_v7 }
  0x8a   :  { %v47_v11 = vmul.f32 0.70710677, %v43_v9  ;;  %v48_v12 = vmul.f32 0.70710677, %v44_v10  ;;  %v45_v15 = vmul.f32 0.5, %v43_v9  ;;  %v46_v18 = vmul.f32 0.5, %v44_v10 }
  0x8c   :  { %197 = verf.f32 %v47_v11 }
  0x8d   :  { %199 = verf.f32 %v48_v12 }
  0x96   :  { %v198_v13 = vpop.eup %197 }
  0x97   :  { %v200_v14 = vpop.eup %199  ;;  %v51_v16 = vadd.f32 1.0, %v198_v13 }
  0x98   :  { %v52_v17 = vadd.f32 1.0, %v200_v14 }
  0x99   :  { %v53_v19 = vmul.f32 %v51_v16, %v45_v15 }
  0x9a   :  { %v54_v21 = vmul.f32 %v52_v17, %v46_v18 }
  0x9b   :  { %v57_v20 = vsel %vm56_vm0, %v53_v19, 0.0 }
  0x9c   :  { %58 = vadd.xlane.f32.xlu1 %v57_v20  ;;  %v60_v22 = vsel %vm56_vm0, %v54_v21, 0.0 }
  0xa0   :  { %61 = vadd.xlane.f32.xlu1 %v60_v22 }
 0x129   :  { %v59_v28 = vpop.xlane.xlu1 %58 }
 0x12a   :  { %v70_v31 = vrot.slane %v59_v28, %v69_v29 }
 0x12d   :  { %v62_v30 = vpop.xlane.xlu1 %61 }
 0x12e   :  { %v74_v32 = vrot.slane %v62_v30, %v69_v29 }
 0x130   :  { %v76_v34 = vsel %vm75_vm3, %v74_v32, %v70_v31 }
 0x131   :  { %v78_v35 = vadd.f32 %v76_v34, %v55_v33 }
 0x133   :  { %80 = vst.msk [vmem:[#allocation2] sm:$0x3] %vm25_vm1, %v78_v35 }
 0x13a   :  { %v84_v36 = vld [vmem:[#allocation2] sm:$0x3] }
 0x13b   :  { %v85_v37 = vmul.f32 0.0625, %v84_v36 }
 0x13d   :  { %190 = vmatmul.mubr.msk.f32.vlgmr.msra.gmra.mrb[0].mxu0 %vm94_vm4, %v85_v37 }
 0x210   :  { %v164_v39 = vpop.f32.mrb[0].mxu0 }
 0x211   :  { %v165_v40 = vadd.f32 %v183_v38, %v164_v39  ;;  %v191_v41 = vpop.f32.mrb[1].mxu0 }
 0x213   :  { %168 = vst.msk [vmem:[#allocation3] sm:$0x3] %vm25_vm1, %v165_v40 }
 0x214   :  { %212 = shalt.err (!%p209_p4)
}
 0x215   :  { %s213_s6 = scalar_lea.hbm %s297_s5, 32 }
 0x216   :  { %p214_p5 = scmp.ne.s32.totalorder %s297_s5, %s213_s6  ;;  %p217_p6 = scmp.lt.u32.totalorder %s213_s6, %s297_s5 }
 0x218   :  { %p219_p7 = pnand %p217_p6, %p214_p5 }
 0x21a   :  { %222 = shalt.err (!%p219_p7)
}
 0x21b   :  { %178 = dma.vmem_to_hbm [thread:$0]  %s176_s27, 32, %s297_s5, [#allocation4]  }
 0x21c   :  { %223 = dma.done.wait [#allocation4], 32  }
 0x21d   :  { %224 = vsyncadd [#allocation4], 4294967264 }
 0x21e   :  { %182 = vsyncpa [#allocation4], 1 }

</bundles_post_ra>
